<compile_context>
chip_gen: v7x
topology: tpu7x:2x2x1
jax: 0.10.0
libtpu: 0.0.40
codegen_flags: <defaults>
</compile_context>

<pallas_src>
import jax
import jax.numpy as jnp
from jax.experimental import pallas as pl
from jax.experimental.pallas import tpu as pltpu

_LANE = 128   # lane width (last dim)
_SUB = 8      # sublane width (second-to-last dim)


def _round_up(n, m):
    return ((n + m - 1) // m) * m


def _mlp_kernel(x_ref, w1_ref, b1_ref, w2_ref, b2_ref, o_ref):
    # Layer 1: x @ W1 + b1, tanh.  Everything is f32 and lane-dense (padded
    # to 128-wide features), so the adds are full-vreg VPU ops and tanh goes
    # to the EUP.
    h = jnp.dot(x_ref[...], w1_ref[...], preferred_element_type=jnp.float32)
    h = jnp.tanh(h + b1_ref[...])          # b1 pre-broadcast: pure VPU add
    # Layer 2: h @ W2 + b2 (keep the f32 accumulator, no intermediate cast).
    out = jnp.dot(h, w2_ref[...], preferred_element_type=jnp.float32)
    o_ref[...] = (out + b2_ref[...]).astype(o_ref.dtype)


def torch_wrapper_forward(x, w1, b1, w2, b2):
    """Pallas implementation of _TorchWrapper(net).forward(x) == net(x)."""
    batch, in_dim = x.shape
    hidden = w1.shape[1]
    out_dim = w2.shape[1]

    bp = _round_up(batch, _SUB)
    ip = _round_up(in_dim, _LANE)
    hp = _round_up(hidden, _LANE)
    op = _round_up(out_dim, _LANE)

    f32 = jnp.float32
    # Zero-pad to lane/sublane-dense shapes.  (In a real solver the weight
    # padding would be done once and cached; shapes here are tiny so the pad
    # cost is negligible.)
    x_p = jnp.zeros((bp, ip), f32).at[:batch, :in_dim].set(x.astype(f32))
    w1_p = jnp.zeros((ip, hp), f32).at[:in_dim, :hidden].set(w1.astype(f32))
    w2_p = jnp.zeros((hp, op), f32).at[:hidden, :out_dim].set(w2.astype(f32))
    b1_p = jnp.zeros((bp, hp), f32).at[:, :hidden].set(
        jnp.broadcast_to(b1.reshape(1, hidden).astype(f32), (bp, hidden)))
    b2_p = jnp.zeros((bp, op), f32).at[:, :out_dim].set(
        jnp.broadcast_to(b2.reshape(1, out_dim).astype(f32), (bp, out_dim)))

    # Gridless call: whole (padded) arrays live in VMEM, single kernel body,
    # no per-grid-step overhead and no double-buffering.
    vmem = pl.BlockSpec(memory_space=pltpu.MemorySpace.VMEM)
    out_p = pl.pallas_call(
        _mlp_kernel,
        out_shape=jax.ShapeDtypeStruct((bp, op), x.dtype),
        in_specs=[vmem, vmem, vmem, vmem, vmem],
        out_specs=vmem,
    )(x_p, w1_p, b1_p, w2_p, b2_p)

    return out_p[:batch, :out_dim]


def reference_forward(x, w1, b1, w2, b2):
    # Pure-JAX reference (== PyTorch: Linear -> tanh -> Linear).
    h = jnp.tanh(x @ w1 + b1)
    return h @ w2 + b2


if __name__ == "__main__":
    key = jax.random.PRNGKey(0)
    batch, in_dim, hidden, out_dim = 8, 32, 64, 32

    kx, k1, kb1, k2, kb2 = jax.random.split(key, 5)
    x = jax.random.normal(kx, (batch, in_dim), dtype=jnp.float32)
    # Deterministic synthetic parameters for the wrapped net.
    w1 = jax.random.normal(k1, (in_dim, hidden), dtype=jnp.float32) * 0.1
    b1 = jax.random.normal(kb1, (1, hidden), dtype=jnp.float32) * 0.01
    w2 = jax.random.normal(k2, (hidden, out_dim), dtype=jnp.float32) * 0.1
    b2 = jax.random.normal(kb2, (1, out_dim), dtype=jnp.float32) * 0.01

    out = torch_wrapper_forward(x, w1, b1, w2, b2)
    jax.block_until_ready(out)

    ref = reference_forward(x, w1, b1, w2, b2)
    assert out.shape == (batch, out_dim)
    assert jnp.allclose(out, ref, atol=1e-5, rtol=1e-5)

    print("KERNEL_OK")
</pallas_src>

<mosaic_0001>
module attributes {stable_mosaic.version = 11 : i64} {
  func.func @_mlp_kernel(%arg0: memref<8x128xf32, #tpu.memory_space<vmem>>, %arg1: memref<128x128xf32, #tpu.memory_space<vmem>>, %arg2: memref<8x128xf32, #tpu.memory_space<vmem>>, %arg3: memref<128x128xf32, #tpu.memory_space<vmem>>, %arg4: memref<8x128xf32, #tpu.memory_space<vmem>>, %arg5: memref<8x128xf32, #tpu.memory_space<vmem>>) attributes {dimension_semantics = [], scalar_prefetch = 0 : i64, scratch_operands = 0 : i64, tpu.core_type = #tpu.core_type<tc>} {
    %c0 = arith.constant 0 : index
    %c0_0 = arith.constant 0 : index
    %0 = vector.load %arg0[%c0, %c0_0] : memref<8x128xf32, #tpu.memory_space<vmem>>, vector<8x128xf32>
    %c0_1 = arith.constant 0 : index
    %c0_2 = arith.constant 0 : index
    %1 = vector.load %arg1[%c0_1, %c0_2] : memref<128x128xf32, #tpu.memory_space<vmem>>, vector<128x128xf32>
    %cst = arith.constant dense<0.000000e+00> : vector<8x128xf32>
    %2 = tpu.matmul %0, %1, %cst {dimension_numbers = #tpu.dot_dimension_numbers<[1], [0], [0], [1], [0, 0, 1, 1], [], []>} : vector<8x128xf32>, vector<128x128xf32>, vector<8x128xf32> -> vector<8x128xf32>
    %c0_3 = arith.constant 0 : index
    %c0_4 = arith.constant 0 : index
    %3 = vector.load %arg2[%c0_3, %c0_4] : memref<8x128xf32, #tpu.memory_space<vmem>>, vector<8x128xf32>
    %4 = arith.addf %2, %3 : vector<8x128xf32>
    %5 = math.tanh %4 : vector<8x128xf32>
    %c0_5 = arith.constant 0 : index
    %c0_6 = arith.constant 0 : index
    %6 = vector.load %arg3[%c0_5, %c0_6] : memref<128x128xf32, #tpu.memory_space<vmem>>, vector<128x128xf32>
    %cst_7 = arith.constant dense<0.000000e+00> : vector<8x128xf32>
    %7 = tpu.matmul %5, %6, %cst_7 {dimension_numbers = #tpu.dot_dimension_numbers<[1], [0], [0], [1], [0, 0, 1, 1], [], []>} : vector<8x128xf32>, vector<128x128xf32>, vector<8x128xf32> -> vector<8x128xf32>
    %c0_8 = arith.constant 0 : index
    %c0_9 = arith.constant 0 : index
    %8 = vector.load %arg4[%c0_8, %c0_9] : memref<8x128xf32, #tpu.memory_space<vmem>>, vector<8x128xf32>
    %9 = arith.addf %7, %8 : vector<8x128xf32>
    %c0_10 = arith.constant 0 : index
    %c0_11 = arith.constant 0 : index
    %10 = vector.load %arg5[%c0_10, %c0_11] : memref<8x128xf32, #tpu.memory_space<vmem>>, vector<8x128xf32>
    tpu.vector_store %arg5[%c0_10, %c0_11], %9 {strides = array<i32>} : memref<8x128xf32, #tpu.memory_space<vmem>>, vector<8x128xf32>,
    return
  }
}

</mosaic_0001>

<bundles_post_ra>
// kernel: tpu_custom_call.1
= control target key start
LH: loop header
LB: loop body
LE: loop exit
PB: predicated region body
PF: predicated region fallthrough
CT: control target
= control target key end

     0   :  { %10 = vsyncpa [#allocation3], 0  ;;  %s673_s0 = inlined_call_operand.hbm [shape: f32[8,128], index: 0, kind: input, shape index: {}]   ;;  %s674_s1 = inlined_call_operand.hbm [shape: f32[128,128], index: 1, kind: input, shape index: {}]   ;;  %s675_s2 = inlined_call_operand.hbm [shape: f32[8,128], index: 2, kind: input, shape index: {}]   ;;  %s676_s3 = inlined_call_operand.hbm [shape: f32[128,128], index: 3, kind: input, shape index: {}]   ;;  %s677_s4 = inlined_call_operand.vmem [shape: f32[8,128], index: 4, kind: input, shape index: {}]   ;;  %s678_s5 = inlined_call_operand.hbm [shape: f32[8,128], index: 5, kind: output, shape index: {}]  }
   0x1   :  { %11 = vsyncpa [#allocation6], 0 }
   0x2   :  { %12 = vsyncpa [#allocation9], 0 }
   0x3   :  { %13 = vsyncpa [#allocation4], 0  ;;  %s548_s18 = smov [#allocation5]   ;;  %s430_s22 = scalar_lea.hbm %s674_s1, 2048 }
   0x4   :  { %s29_s19 = sshll.u32 %s548_s18, 4  ;;  %p431_p0 = scmp.ne.s32.totalorder %s674_s1, %s430_s22  ;;  %s30_s19 = int_to_ptr.vmem [resolvable:$true] %s29_s19 }
   0x5   :  { %p434_p1 = scmp.lt.u32.totalorder %s430_s22, %s674_s1 }
   0x7   :  { %p436_p2 = pnand %p434_p1, %p431_p0 }
   0x9   :  { %439 = shalt.err (!%p436_p2)
}
   0xa   :  { %s440_s27 = scalar_lea.vmem %s30_s19, 2048  ;;  %p445_p4 = scmp.lt.s32.totalorder %s30_s19, %s30_s19 }
   0xb   :  { %p441_p3 = scmp.ne.s32.totalorder %s30_s19, %s440_s27  ;;  %p446_p5 = scmp.lt.s32.totalorder %s440_s27, %s440_s27 }
   0xd   :  { %p447_p6 = por %p446_p5, %p445_p4 }
   0xf   :  { %p448_p7 = pnand %p447_p6, %p441_p3 }
  0x11   :  { %451 = shalt.err (!%p448_p7)
}
  0x12   :  { %s549_s28 = smov 128   ;;  %s550_s29 = smov 8  }
  0x13   :  { %35 = dma.hbm_to_vmem [thread:$0]  %s674_s1, 2048, %s30_s19, [#allocation6], %s549_s28, %s549_s28, %s550_s29  }
  0x14   :  { %s551_s7 = smov [#allocation2]   ;;  %s552_s9 = smov [#allocation7]  }
  0x15   :  { %s20_s8 = sshll.u32 %s551_s7, 4  ;;  %s42_s10 = sshll.u32 %s552_s9, 4  ;;  %s21_s8 = int_to_ptr.vmem [resolvable:$true] %s20_s8  ;;  %s43_s10 = int_to_ptr.vmem [resolvable:$true] %s42_s10 }
  0x16   :  { %s452_s13 = scalar_lea.hbm %s673_s0, 128 }
  0x17   :  { %p453_p8 = scmp.ne.s32.totalorder %s673_s0, %s452_s13  ;;  %p456_p9 = scmp.lt.u32.totalorder %s452_s13, %s673_s0 }
  0x19   :  { %p458_p10 = pnand %p456_p9, %p453_p8 }
  0x1b   :  { %461 = shalt.err (!%p458_p10)
}
  0x1c   :  { %s462_s1 = scalar_lea.vmem %s21_s8, 128  ;;  %p467_p12 = scmp.lt.s32.totalorder %s21_s8, %s21_s8 }
  0x1d   :  { %p463_p11 = scmp.ne.s32.totalorder %s21_s8, %s462_s1  ;;  %p468_p13 = scmp.lt.s32.totalorder %s462_s1, %s462_s1 }
  0x1f   :  { %p469_p0 = por %p468_p13, %p467_p12 }
  0x21   :  { %p470_p1 = pnand %p469_p0, %p463_p11 }
  0x23   :  { %473 = shalt.err (!%p470_p1)
}
  0x24   :  { %23 = dma.hbm_to_vmem [thread:$0]  %s673_s0, 128, %s21_s8, [#allocation3]  }
  0x25   :  { %s474_s22 = scalar_lea.hbm %s675_s2, 128 }
  0x26   :  { %p475_p2 = scmp.ne.s32.totalorder %s675_s2, %s474_s22  ;;  %p478_p3 = scmp.lt.u32.totalorder %s474_s22, %s675_s2 }
  0x28   :  { %p480_p4 = pnand %p478_p3, %p475_p2 }
  0x2a   :  { %483 = shalt.err (!%p480_p4)
}
  0x2b   :  { %s484_s27 = scalar_lea.vmem %s43_s10, 128  ;;  %p489_p6 = scmp.lt.s32.totalorder %s43_s10, %s43_s10 }
  0x2c   :  { %p485_p5 = scmp.ne.s32.totalorder %s43_s10, %s484_s27  ;;  %p490_p7 = scmp.lt.s32.totalorder %s484_s27, %s484_s27 }
  0x2e   :  { %p491_p8 = por %p490_p7, %p489_p6 }
  0x30   :  { %p492_p9 = pnand %p491_p8, %p485_p5 }
  0x32   :  { %495 = shalt.err (!%p492_p9)
}
  0x33   :  { %45 = dma.hbm_to_vmem [thread:$0]  %s675_s2, 128, %s43_s10, [#allocation6]  }
  0x34   :  { %s553_s6 = smov [#allocation8]   ;;  %s496_s11 = scalar_lea.hbm %s676_s3, 2048 }
  0x35   :  { %s51_s7 = sshll.u32 %s553_s6, 4  ;;  %p497_p10 = scmp.ne.s32.totalorder %s676_s3, %s496_s11  ;;  %s52_s7 = int_to_ptr.vmem [resolvable:$true] %s51_s7 }
  0x36   :  { %p500_p11 = scmp.lt.u32.totalorder %s496_s11, %s676_s3 }
  0x38   :  { %p502_p12 = pnand %p500_p11, %p497_p10 }
  0x3a   :  { %505 = shalt.err (!%p502_p12)
}
  0x3b   :  { %s506_s16 = scalar_lea.vmem %s52_s7, 2048  ;;  %p511_p0 = scmp.lt.s32.totalorder %s52_s7, %s52_s7 }
  0x3c   :  { %p507_p13 = scmp.ne.s32.totalorder %s52_s7, %s506_s16  ;;  %p512_p1 = scmp.lt.s32.totalorder %s506_s16, %s506_s16 }
  0x3e   :  { %p513_p2 = por %p512_p1, %p511_p0 }
  0x40   :  { %p514_p3 = pnand %p513_p2, %p507_p13 }
  0x42   :  { %517 = shalt.err (!%p514_p3)
}
  0x43   :  { %57 = dma.hbm_to_vmem [thread:$0]  %s676_s3, 2048, %s52_s7, [#allocation9], %s549_s28, %s549_s28, %s550_s29  }
  0x44   :  { %540 = dma.done.wait [#allocation3], 128  }
  0x45   :  { %541 = vsyncadd [#allocation3], 4294967168 }
  0x46   :  { %542 = dma.done.wait [#allocation6], 2176  }
  0x47   :  { %543 = vsyncadd [#allocation6], 4294965120 }
  0x48   :  { %544 = dma.done.wait [#allocation9], 2048  }
  0x49   :  { %545 = vsyncadd [#allocation9], 4294965248  ;;  %v554_v0 = vmov 0.0|0.0   ;;  %vm555_vm0 = vmmov 0   ;;  %v556_v1 = vmov 0.0   ;;  %v73_v2 = vld [vmem:[#allocation5] sm:$0xff] }
  0x4a   :  { %370 = vmatprep.subr.bf16.mxu0 %v554_v0  ;;  %332 = vmatprep.mubr.msk.f32.mxu0 %vm555_vm0, %v556_v1  ;;  %v74_v3 = vld [vmem:[#allocation5 + $0x8] sm:$0xff]  ;;  %v75_v4 = vld [vmem:[#allocation5 + $0x10] sm:$0xff]  ;;  %v76_v6 = vld [vmem:[#allocation5 + $0x18] sm:$0xff]  ;;  %s557_s29 = smov [#allocation10]  }
  0x4b   :  { %394 = vmatprep.subr.bf16.mxu1 %v554_v0  ;;  %367 = vmatprep.mubr.msk.f32.mxu1 %vm555_vm0, %v556_v1  ;;  %v371_v5 = vpack.c.bf16 %v74_v3, %v73_v2  ;;  %v374_v7 = vpack.c.bf16 %v76_v6, %v75_v4  ;;  %v77_v8 = vld [vmem:[#allocation5 + $0x20] sm:$0xff]  ;;  %v78_v9 = vld [vmem:[#allocation5 + $0x28] sm:$0xff]  ;;  %v162_v11 = vld [vmem:[#allocation8 + $0x8] sm:$0xff]  ;;  %s255_s17 = sshll.u32 %s557_s29, 4  ;;  %s256_s17 = int_to_ptr.vmem [resolvable:$true] %s255_s17 }
  0x4c   :  { %v161_v10 = vld [vmem:[#allocation8] sm:$0xff]  ;;  %v163_v12 = vld [vmem:[#allocation8 + $0x10] sm:$0xff]  ;;  %v164_v13 = vld [vmem:[#allocation8 + $0x18] sm:$0xff]  ;;  %v377_v14 = vpack.c.bf16 %v78_v9, %v77_v8  ;;  %s518_s1 = scalar_lea.vmem %s256_s17, 128  ;;  %p523_p5 = scmp.lt.s32.totalorder %s256_s17, %s256_s17 }
  0x4d   :  { %372 = vmatpush3.bf16.msra.mxu0 %v371_v5  ;;  %v395_v15 = vpack.c.bf16 %v162_v11, %v161_v10  ;;  %v79_v16 = vld [vmem:[#allocation5 + $0x30] sm:$0xff]  ;;  %v80_v17 = vld [vmem:[#allocation5 + $0x38] sm:$0xff]  ;;  %v398_v18 = vpack.c.bf16 %v164_v13, %v163_v12  ;;  %v165_v19 = vld [vmem:[#allocation8 + $0x20] sm:$0xff]  ;;  %p519_p4 = scmp.ne.s32.totalorder %s256_s17, %s518_s1  ;;  %p524_p6 = scmp.lt.s32.totalorder %s518_s1, %s518_s1 }
  0x4e   :  { %373 = vmatprep.subr.bf16.mxu0 %v554_v0  ;;  %v166_v20 = vld [vmem:[#allocation8 + $0x28] sm:$0xff]  ;;  %v380_v21 = vpack.c.bf16 %v80_v17, %v79_v16  ;;  %v81_v22 = vld [vmem:[#allocation5 + $0x40] sm:$0xff]  ;;  %v82_v23 = vld [vmem:[#allocation5 + $0x48] sm:$0xff] }
  0x4f   :  { %396 = vmatpush3.bf16.msra.mxu1 %v395_v15  ;;  %v401_v24 = vpack.c.bf16 %v166_v20, %v165_v19  ;;  %v167_v25 = vld [vmem:[#allocation8 + $0x30] sm:$0xff]  ;;  %v168_v26 = vld [vmem:[#allocation8 + $0x38] sm:$0xff]  ;;  %v383_v27 = vpack.c.bf16 %v82_v23, %v81_v22  ;;  %v83_v28 = vld [vmem:[#allocation5 + $0x50] sm:$0xff]  ;;  %p525_p7 = por %p524_p6, %p523_p5 }
  0x50   :  { %397 = vmatprep.subr.bf16.mxu1 %v554_v0  ;;  %v84_v29 = vld [vmem:[#allocation5 + $0x58] sm:$0xff]  ;;  %v404_v30 = vpack.c.bf16 %v168_v26, %v167_v25  ;;  %v169_v31 = vld [vmem:[#allocation8 + $0x40] sm:$0xff]  ;;  %v170_v32 = vld [vmem:[#allocation8 + $0x48] sm:$0xff] }
  0x51   :  { %375 = vmatpush3.bf16.msra.mxu0 %v374_v7  ;;  %v386_v33 = vpack.c.bf16 %v84_v29, %v83_v28  ;;  %v85_v34 = vld [vmem:[#allocation5 + $0x60] sm:$0xff]  ;;  %v86_v35 = vld [vmem:[#allocation5 + $0x68] sm:$0xff]  ;;  %v407_v36 = vpack.c.bf16 %v170_v32, %v169_v31  ;;  %v87_v38 = vld [vmem:[#allocation5 + $0x70] sm:$0xff]  ;;  %p526_p8 = pnand %p525_p7, %p519_p4 }
  0x52   :  { %376 = vmatprep.subr.bf16.mxu0 %v554_v0  ;;  %v389_v37 = vpack.c.bf16 %v86_v35, %v85_v34  ;;  %v88_v39 = vld [vmem:[#allocation5 + $0x78] sm:$0xff]  ;;  %v172_v43 = vld [vmem:[#allocation8 + $0x58] sm:$0xff]  ;;  %v173_v45 = vld [vmem:[#allocation8 + $0x60] sm:$0xff] }
  0x53   :  { %399 = vmatpush3.bf16.msra.mxu1 %v398_v18  ;;  %v392_v40 = vpack.c.bf16 %v88_v39, %v87_v38  ;;  %v72_v41 = vld [vmem:[#allocation2] sm:$0xff]  ;;  %v174_v46 = vld [vmem:[#allocation8 + $0x68] sm:$0xff]  ;;  %v176_v49 = vld [vmem:[#allocation8 + $0x78] sm:$0xff] }
  0x54   :  { %400 = vmatprep.subr.bf16.mxu1 %v554_v0  ;;  %v171_v42 = vld [vmem:[#allocation8 + $0x50] sm:$0xff]  ;;  %v413_v47 = vpack.c.bf16 %v174_v46, %v173_v45  ;;  %v89_v51 = vld [vmem:[#allocation7] sm:$0xff] }
  0x55   :  { %378 = vmatpush3.bf16.msra.mxu0 %v377_v14  ;;  %v410_v44 = vpack.c.bf16 %v172_v43, %v171_v42  ;;  %v175_v48 = vld [vmem:[#allocation8 + $0x70] sm:$0xff] }
  0x56   :  { %379 = vmatprep.subr.bf16.mxu0 %v554_v0  ;;  %v416_v50 = vpack.c.bf16 %v176_v49, %v175_v48  ;;  %v177_v56 = vld [vmem:[%s677_s4] sm:$0xff] }
  0x57   :  { %402 = vmatpush3.bf16.msra.mxu1 %v401_v24 }
  0x58   :  { %403 = vmatprep.subr.bf16.mxu1 %v554_v0 }
  0x59   :  { %381 = vmatpush3.bf16.msra.mxu0 %v380_v21 }
  0x5a   :  { %382 = vmatprep.subr.bf16.mxu0 %v554_v0 }
  0x5b   :  { %405 = vmatpush3.bf16.msra.mxu1 %v404_v30 }
  0x5c   :  { %406 = vmatprep.subr.bf16.mxu1 %v554_v0 }
  0x5d   :  { %384 = vmatpush3.bf16.msra.mxu0 %v383_v27 }
  0x5e   :  { %385 = vmatprep.subr.bf16.mxu0 %v554_v0 }
  0x5f   :  { %408 = vmatpush3.bf16.msra.mxu1 %v407_v36 }
  0x60   :  { %409 = vmatprep.subr.bf16.mxu1 %v554_v0 }
  0x61   :  { %387 = vmatpush3.bf16.msra.mxu0 %v386_v33 }
  0x62   :  { %388 = vmatprep.subr.bf16.mxu0 %v554_v0 }
  0x63   :  { %411 = vmatpush3.bf16.msra.mxu1 %v410_v44 }
  0x64   :  { %412 = vmatprep.subr.bf16.mxu1 %v554_v0 }
  0x65   :  { %390 = vmatpush3.bf16.msra.mxu0 %v389_v37 }
  0x66   :  { %391 = vmatprep.subr.bf16.mxu0 %v554_v0 }
  0x67   :  { %414 = vmatpush3.bf16.msra.mxu1 %v413_v47 }
  0x68   :  { %415 = vmatprep.subr.bf16.mxu1 %v554_v0 }
  0x69   :  { %393 = vmatpush3.bf16.msra.mxu0 %v392_v40 }
  0x6b   :  { %417 = vmatpush3.bf16.msra.mxu1 %v416_v50 }
  0x6c   :  { %333 = vmatmul.mubr.f32.vlgmr.msra.gmra.mrb[0].mxu0 %v72_v41 }
 0x13f   :  { %v156_v52 = vpop.f32.mrb[0].mxu0 }
 0x140   :  { %v157_v53 = vadd.f32 %v156_v52, %v89_v51  ;;  %v334_v54 = vpop.f32.mrb[1].mxu0 }
 0x142   :  { %428 = vtanh.f32 %v157_v53 }
 0x14c   :  { %v429_v55 = vpop.eup %428 }
 0x14d   :  { %368 = vmatmul.mubr.f32.vlgmr.msra.gmra.mrb[0].mxu1 %v429_v55 }
 0x220   :  { %v244_v57 = vpop.f32.mrb[0].mxu1 }
 0x221   :  { %v245_v58 = vadd.f32 %v244_v57, %v177_v56  ;;  %v369_v59 = vpop.f32.mrb[1].mxu1 }
 0x223   :  { %248 = vst [vmem:[#allocation10] sm:$0xff] %v245_v58 }
 0x224   :  { %529 = shalt.err (!%p526_p8)
}
 0x225   :  { %s530_s20 = scalar_lea.hbm %s678_s5, 128 }
 0x226   :  { %p531_p9 = scmp.ne.s32.totalorder %s678_s5, %s530_s20  ;;  %p534_p10 = scmp.lt.u32.totalorder %s530_s20, %s678_s5 }
 0x228   :  { %p536_p11 = pnand %p534_p10, %p531_p9 }
 0x22a   :  { %539 = shalt.err (!%p536_p11)
}
 0x22b   :  { %258 = dma.vmem_to_hbm [thread:$0]  %s256_s17, 128, %s678_s5, [#allocation4]  }
 0x22c   :  { %546 = dma.done.wait [#allocation4], 128  }
 0x22d   :  { %547 = vsyncadd [#allocation4], 4294967168 }
 0x22e   :  { %262 = vsyncpa [#allocation3], 1 }
 0x22f   :  { %263 = vsyncpa [#allocation6], 1 }
 0x230   :  { %264 = vsyncpa [#allocation9], 1 }
 0x231   :  { %265 = vsyncpa [#allocation4], 1 }

</bundles_post_ra>
